<compile_context>
chip_gen: v7x
topology: tpu7x:2x2x1
jax: 0.10.0
libtpu: 0.0.40
codegen_flags: <defaults>
</compile_context>

<pallas_src>
import functools

import jax
import jax.numpy as jnp
from jax import lax
from jax.experimental import pallas as pl
from jax.experimental.pallas import tpu as pltpu

GAMMA = 2.0  # module default
# TODO(synk): per-class `weight` (CrossEntropyLoss(weight=...)) not implemented;
# only the module's default weight=None path is covered.


def _round_up(x, m):
    return ((x + m - 1) // m) * m


def _focal_loss_kernel(logits_ref, targets_ref, out_ref, acc_ref, *,
                       n_total, gamma):
    i = pl.program_id(0)

    @pl.when(i == 0)
    def _init():
        acc_ref[...] = jnp.zeros_like(acc_ref)

    x = logits_ref[...].astype(jnp.float32)            # (TN, C) f32 compute
    t = targets_ref[...]                                # (TN, 1) int32
    tn, c = x.shape

    # Numerically-stable log-softmax pieces.
    m = jnp.max(x, axis=-1, keepdims=True)              # (TN, 1)
    shifted = x - m                                      # (TN, C)
    lse = jnp.log(jnp.sum(jnp.exp(shifted), axis=-1, keepdims=True))  # (TN, 1)

    # Gather the target-class logit via a one-hot mask (no dynamic gather on TPU).
    class_ids = lax.broadcasted_iota(jnp.int32, (tn, c), 1)            # (TN, C)
    onehot = class_ids == t                                            # (TN, C)
    tgt_logit = jnp.sum(jnp.where(onehot, shifted, 0.0),
                        axis=-1, keepdims=True)                        # (TN, 1)

    ce_per = lse - tgt_logit                                           # (TN, 1)

    # Mask out padded rows of the (possibly partial) last tile.
    row = i * tn + lax.broadcasted_iota(jnp.int32, (tn, 1), 0)
    ce_per = jnp.where(row < n_total, ce_per, 0.0)

    # Accumulate the CE sum into the resident scratch.
    acc_ref[...] += jnp.sum(ce_per, axis=0, keepdims=True)             # (1, 1)

    @pl.when(i == pl.num_programs(0) - 1)
    def _finalize():
        ce = acc_ref[...] / float(n_total)               # mean over true N
        pt = jnp.exp(-ce)
        one_m_pt = 1.0 - pt
        if gamma == 2.0:
            mod = one_m_pt * one_m_pt                    # avoid float pow lowering
        else:
            mod = one_m_pt ** gamma
        out_ref[...] = (mod * ce).astype(out_ref.dtype)


def focal_loss(inputs, targets, *, block_rows=256, gamma=GAMMA):
    """inputs: (N, C) float logits (f32 or bf16), targets: (N,) int class ids."""
    n, c = inputs.shape
    targets2d = targets.astype(jnp.int32).reshape(n, 1)

    # Row tile: multiple of 32 sublanes (layout-safe for f32/bf16), no bigger
    # than needed for small N.
    tn = min(_round_up(block_rows, 32), _round_up(n, 32))
    grid = pl.cdiv(n, tn)

    # Double-buffered logits + targets blocks plus slack; clamp so the limit
    # is sane on every generation (v7x physical VMEM is only 64 MiB).
    itemsize = jnp.dtype(inputs.dtype).itemsize
    vmem_bytes = 2 * (tn * c * itemsize + tn * 4) + (1 << 20)
    vmem_limit = int(min(100 * 1024 * 1024, max(32 * 1024 * 1024, vmem_bytes)))

    kernel = functools.partial(_focal_loss_kernel, n_total=n, gamma=gamma)

    out = pl.pallas_call(
        kernel,
        out_shape=jax.ShapeDtypeStruct((1, 1), jnp.float32),
        grid_spec=pltpu.PrefetchScalarGridSpec(
            num_scalar_prefetch=0,
            grid=(grid,),
            in_specs=[
                pl.BlockSpec((tn, c), lambda i: (i, 0)),   # logits tile
                pl.BlockSpec((tn, 1), lambda i: (i, 0)),   # targets tile
            ],
            out_specs=pl.BlockSpec((1, 1), lambda i: (0, 0)),
            scratch_shapes=[pltpu.VMEM((1, 1), jnp.float32)],
        ),
        compiler_params=pltpu.CompilerParams(
            dimension_semantics=("arbitrary",),  # reduction axis: resident accumulator
            vmem_limit_bytes=vmem_limit,
        ),
    )(inputs, targets2d)  # NOTE: native dtype passed through (no wrapper up-cast)
    return out[0, 0]


def _focal_loss_ref(inputs, targets, gamma=GAMMA):
    logp = jax.nn.log_softmax(inputs.astype(jnp.float32), axis=-1)
    ce = -jnp.mean(jnp.take_along_axis(logp, targets[:, None], axis=-1))
    pt = jnp.exp(-ce)
    return (1.0 - pt) ** gamma * ce


if __name__ == "__main__":
    key = jax.random.PRNGKey(0)
    k_logits, k_targets = jax.random.split(key)

    N, C = 80, 32
    logits_f32 = jax.random.normal(k_logits, (N, C), dtype=jnp.float32)
    targets = jax.random.randint(k_targets, (N,), 0, C, dtype=jnp.int32)

    # f32 path: 3 row-tiles of 32 (last tile partially padded -> masking path).
    out_f32 = jax.block_until_ready(focal_loss(logits_f32, targets, block_rows=32))
    ref_f32 = _focal_loss_ref(logits_f32, targets)
    assert jnp.allclose(out_f32, ref_f32, rtol=1e-5, atol=1e-5), (out_f32, ref_f32)

    # bf16 path: native dtype goes straight through pallas_call (no up-cast).
    logits_bf16 = logits_f32.astype(jnp.bfloat16)
    out_bf16 = jax.block_until_ready(focal_loss(logits_bf16, targets, block_rows=32))
    ref_bf16 = _focal_loss_ref(logits_bf16, targets)
    assert jnp.allclose(out_bf16, ref_bf16, rtol=1e-3, atol=1e-3), (out_bf16, ref_bf16)

    print("KERNEL_OK")
</pallas_src>

<mosaic_0001>
module attributes {stable_mosaic.version = 11 : i64} {
  func.func @_focal_loss_kernel(%arg0: i32, %arg1: memref<32x32xf32, #tpu.memory_space<vmem>>, %arg2: memref<32x1xi32, #tpu.memory_space<vmem>>, %arg3: memref<1x1xf32, #tpu.memory_space<vmem>>, %arg4: memref<1x1xf32, #tpu.memory_space<vmem>>) attributes {dimension_semantics = [#tpu.dimension_semantics<arbitrary>], iteration_bounds = array<i64: 3>, scalar_prefetch = 0 : i64, scratch_operands = 1 : i64, tpu.core_type = #tpu.core_type<tc>, window_params = [{transform_indices = @transform_0, window_bounds = array<i64: 32, 32>}, {transform_indices = @transform_1, window_bounds = array<i64: 32, 1>}, {pipeline_mode = #tpu.pipeline_mode<synchronous>, transform_indices = @transform_2, window_bounds = array<i64: 1, 1>}]} {
    %c0_i32 = arith.constant 0 : i32
    %0 = arith.cmpi eq, %arg0, %c0_i32 : i32
    %1 = arith.extui %0 : i1 to i32
    %c0_i32_0 = arith.constant 0 : i32
    %2 = arith.cmpi ne, %1, %c0_i32_0 : i32
    scf.if %2 {
      %cst_14 = arith.constant 0.000000e+00 : f32
      %37 = vector.broadcast %cst_14 : f32 to vector<1x1xf32>
      %c0_15 = arith.constant 0 : index
      %c0_16 = arith.constant 0 : index
      %38 = vector.load %arg4[%c0_15, %c0_16] : memref<1x1xf32, #tpu.memory_space<vmem>>, vector<1x1xf32>
      tpu.vector_store %arg4[%c0_15, %c0_16], %37 {strides = array<i32>} : memref<1x1xf32, #tpu.memory_space<vmem>>, vector<1x1xf32>,
    } else {
    }
    %c0 = arith.constant 0 : index
    %c0_1 = arith.constant 0 : index
    %3 = vector.load %arg1[%c0, %c0_1] : memref<32x32xf32, #tpu.memory_space<vmem>>, vector<32x32xf32>
    %c0_2 = arith.constant 0 : index
    %c0_3 = arith.constant 0 : index
    %4 = vector.load %arg2[%c0_2, %c0_3] : memref<32x1xi32, #tpu.memory_space<vmem>>, vector<32x1xi32>
    %cst = arith.constant dense<0xFF800000> : vector<32xf32>
    %5 = vector.multi_reduction <maximumf>, %3, %cst [1] : vector<32x32xf32> to vector<32xf32>
    %6 = vector.shape_cast %5 : vector<32xf32> to vector<32x1xf32>
    %7 = vector.broadcast %6 : vector<32x1xf32> to vector<32x32xf32>
    %8 = arith.subf %3, %7 : vector<32x32xf32>
    %9 = math.exp %8 : vector<32x32xf32>
    %cst_4 = arith.constant dense<0.000000e+00> : vector<32xf32>
    %10 = vector.multi_reduction <add>, %9, %cst_4 [1] : vector<32x32xf32> to vector<32xf32>
    %11 = vector.shape_cast %10 : vector<32xf32> to vector<32x1xf32>
    %12 = math.log %11 : vector<32x1xf32>
    %13 = tpu.iota {dimensions = array<i32: 1>} : vector<32x32xi32>
    %14 = vector.broadcast %4 : vector<32x1xi32> to vector<32x32xi32>
    %15 = arith.cmpi eq, %13, %14 : vector<32x32xi32>
    %cst_5 = arith.constant 0.000000e+00 : f32
    %16 = vector.broadcast %cst_5 : f32 to vector<32x32xf32>
    %17 = arith.select %15, %8, %16 : vector<32x32xi1>, vector<32x32xf32>
    %cst_6 = arith.constant dense<0.000000e+00> : vector<32xf32>
    %18 = vector.multi_reduction <add>, %17, %cst_6 [1] : vector<32x32xf32> to vector<32xf32>
    %19 = vector.shape_cast %18 : vector<32xf32> to vector<32x1xf32>
    %20 = arith.subf %12, %19 : vector<32x1xf32>
    %c32_i32 = arith.constant 32 : i32
    %21 = arith.muli %arg0, %c32_i32 : i32
    %22 = tpu.iota {dimensions = array<i32: 0>} : vector<32x1xi32>
    %23 = vector.broadcast %21 : i32 to vector<32x1xi32>
    %24 = arith.addi %23, %22 : vector<32x1xi32>
    %c80_i32 = arith.constant 80 : i32
    %25 = vector.broadcast %c80_i32 : i32 to vector<32x1xi32>
    %26 = arith.cmpi slt, %24, %25 : vector<32x1xi32>
    %cst_7 = arith.constant 0.000000e+00 : f32
    %27 = vector.broadcast %cst_7 : f32 to vector<32x1xf32>
    %28 = arith.select %26, %20, %27 : vector<32x1xi1>, vector<32x1xf32>
    %c0_8 = arith.constant 0 : index
    %c0_9 = arith.constant 0 : index
    %29 = vector.load %arg4[%c0_8, %c0_9] : memref<1x1xf32, #tpu.memory_space<vmem>>, vector<1x1xf32>
    %cst_10 = arith.constant dense<0.000000e+00> : vector<1xf32>
    %30 = vector.multi_reduction <add>, %28, %cst_10 [0] : vector<32x1xf32> to vector<1xf32>
    %31 = vector.shape_cast %30 : vector<1xf32> to vector<1x1xf32>
    %32 = arith.addf %29, %31 : vector<1x1xf32>
    %c0_11 = arith.constant 0 : index
    %c0_12 = arith.constant 0 : index
    %33 = vector.load %arg4[%c0_11, %c0_12] : memref<1x1xf32, #tpu.memory_space<vmem>>, vector<1x1xf32>
    tpu.vector_store %arg4[%c0_11, %c0_12], %32 {strides = array<i32>} : memref<1x1xf32, #tpu.memory_space<vmem>>, vector<1x1xf32>,
    %c2_i32 = arith.constant 2 : i32
    %34 = arith.cmpi eq, %arg0, %c2_i32 : i32
    %35 = arith.extui %34 : i1 to i32
    %c0_i32_13 = arith.constant 0 : i32
    %36 = arith.cmpi ne, %35, %c0_i32_13 : i32
    scf.if %36 {
      %c0_14 = arith.constant 0 : index
      %c0_15 = arith.constant 0 : index
      %37 = vector.load %arg4[%c0_14, %c0_15] : memref<1x1xf32, #tpu.memory_space<vmem>>, vector<1x1xf32>
      %cst_16 = arith.constant 8.000000e+01 : f32
      %38 = vector.broadcast %cst_16 : f32 to vector<1x1xf32>
      %39 = arith.divf %37, %38 : vector<1x1xf32>
      %cst_17 = arith.constant 0.000000e+00 : f32
      %40 = vector.broadcast %cst_17 : f32 to vector<1x1xf32>
      %41 = arith.subf %40, %39 : vector<1x1xf32>
      %42 = math.exp %41 : vector<1x1xf32>
      %cst_18 = arith.constant 1.000000e+00 : f32
      %43 = vector.broadcast %cst_18 : f32 to vector<1x1xf32>
      %44 = arith.subf %43, %42 : vector<1x1xf32>
      %45 = arith.mulf %44, %44 : vector<1x1xf32>
      %46 = arith.mulf %45, %39 : vector<1x1xf32>
      %c0_19 = arith.constant 0 : index
      %c0_20 = arith.constant 0 : index
      %47 = vector.load %arg3[%c0_19, %c0_20] : memref<1x1xf32, #tpu.memory_space<vmem>>, vector<1x1xf32>
      tpu.vector_store %arg3[%c0_19, %c0_20], %46 {strides = array<i32>} : memref<1x1xf32, #tpu.memory_space<vmem>>, vector<1x1xf32>,
    } else {
    }
    return
  }
  func.func @transform_0(%arg0: i32) -> (i32, i32) {
    %c0_i32 = arith.constant 0 : i32
    %c0_i32_0 = arith.constant 0 : i32
    return %arg0, %c0_i32 : i32, i32
  }
  func.func @transform_1(%arg0: i32) -> (i32, i32) {
    %c0_i32 = arith.constant 0 : i32
    %c0_i32_0 = arith.constant 0 : i32
    return %arg0, %c0_i32 : i32, i32
  }
  func.func @transform_2(%arg0: i32) -> (i32, i32) {
    %c0_i32 = arith.constant 0 : i32
    %c0_i32_0 = arith.constant 0 : i32
    %c0_i32_1 = arith.constant 0 : i32
    return %c0_i32, %c0_i32_0 : i32, i32
  }
}

</mosaic_0001>

<bundles_post_ra>
// kernel: tpu_custom_call.1
= control target key start
LH: loop header
LB: loop body
LE: loop exit
PB: predicated region body
PF: predicated region fallthrough
CT: control target
= control target key end

     0   :  { %7 = vsyncpa [#allocation4], 0  ;;  %s503_s9 = smov 0   ;;  %s561_s0 = inlined_call_operand.vmem [shape: f32[80,32], index: 0, kind: input, shape index: {}]   ;;  %s562_s1 = inlined_call_operand.vmem [shape: s32[80,1], index: 1, kind: input, shape index: {}]   ;;  %s563_s2 = inlined_call_operand.hbm [shape: f32[1,1], index: 2, kind: output, shape index: {}]  }
   0x1 LB: > { %s509_s10 = sadd.s32 4294967295, %s483_s9   ;;  %p398_p0 = scmp.ge.s32.totalorder %s483_s9, 1  ;;  %s483_s9 = sphi %s503_s9, %s13_s9  }
   0x2   : > { %p136_p1 = scmp.lt.s32.totalorder %s483_s9, 4 }
   0x4   : > { %p137_p2 = pnand %p398_p0, %p136_p1 }
   0x5   : > { %s399_s11 = sshll.u32 (!%p137_p2), %s509_s10, 2  ;;  %p403_p4 = scmp.ne.s32.totalorder (!%p137_p2), %s509_s10, 0 }
   0x6   : > { %140 = sbr.rel (%p137_p2) target bundleno = 421 (0x1a5), region = 28  ;;  %p171_p3 = scmp.lt.s32.totalorder (!%p137_p2), %s399_s11, 9 }
   0xd   : > { %s565_s11 = smov (!%p171_p3, %s399_s11), 9  ;;  %197 = sbr.rel (%p403_p4) target bundleno = 20 (0x14), region = 32 }
   0xe   : > { %s400_s12 = sshll.u32 %s565_s11, 3  ;;  %vm198_vm0 = vcmask (!%p403_p4), 0   ;;  %v485_v0 = vmov (!%p403_p4), 0.0  }
   0xf   : > { %s174_s15 = scalar_lea.vmem %s561_s0, %s400_s12  ;;  %s188_s18 = scalar_lea.vmem %s562_s1, %s400_s12  ;;  %199 = vst.msk [vmem:[#allocation2] sm:$0x1] (!%p403_p4), %vm198_vm0, %v485_v0 }
  0x14 PF: > { %v202_v1 = vld [vmem:[%s174_s15 + $0x10] sm:$0xff]  ;;  %vm208_vm1 = vcmask 261120   ;;  %v200_v2 = vld [vmem:[%s174_s15] sm:$0xff]  ;;  %v203_v3 = vld [vmem:[%s174_s15 + $0x18] sm:$0xff]  ;;  %v486_v7 = vmov 0   ;;  %v253_v27 = vlaneseq  ;;  %s404_s19 = sshll.u32 %s509_s10, 5 }
  0x15   : > { %v215_v4 = vsel %vm208_vm1, %v202_v1, -inf  ;;  %v209_v5 = vsel %vm208_vm1, %v200_v2, -inf  ;;  %v201_v6 = vld [vmem:[%s174_s15 + $0x8] sm:$0xff]  ;;  %428 = vset.pattern.permute.xlu1 %v486_v7  ;;  %427 = vset.pattern.permute.xlu0 %v486_v7  ;;  %v218_v8 = vsel %vm208_vm1, %v203_v3, -inf  ;;  %v206_v11 = vld [vmem:[%s188_s18 + $0x10] sm:$0xff]  ;;  %v204_v12 = vld [vmem:[%s188_s18] sm:$0xff]  ;;  %v297_v55 = vstv %s404_s19 }
  0x16   : > { %216 = vmax.xlane.f32.xlu1 %v215_v4  ;;  %210 = vmax.xlane.f32.xlu0 %v209_v5  ;;  %v212_v9 = vsel %vm208_vm1, %v201_v6, -inf  ;;  %v205_v10 = vld [vmem:[%s188_s18 + $0x8] sm:$0xff]  ;;  %v207_v13 = vld [vmem:[%s188_s18 + $0x18] sm:$0xff]  ;;  %v254_v31 = vand.u32 127, %v253_v27  ;;  %v293_v51 = vshrl.u32 %v253_v27, 7  ;;  %vm321_vm10 = vcmask 0  }
  0x17   : > { %p405_p5 = scmp.ne.s32.totalorder %s509_s10, 2 }
  0x18   : > { %v294_v53 = vadd.s32 8, %v293_v51  ;;  %v295_v56 = vadd.s32 16, %v293_v51  ;;  %v296_v59 = vadd.s32 24, %v293_v51  ;;  %v298_v60 = vadd.s32 %v297_v55, %v293_v51 }
  0x1a   : > { %219 = vmax.xlane.f32.xlu1 %v218_v8  ;;  %213 = vmax.xlane.f32.xlu0 %v212_v9  ;;  %v299_v61 = vadd.s32 %v297_v55, %v294_v53  ;;  %v301_v5 = vadd.s32 %v297_v55, %v296_v59  ;;  %vm302_vm6 = vcmp.lt.s32.totalorder %v298_v60, 80 }
  0x1c   : > { %vm303_vm7 = vcmp.lt.s32.totalorder %v299_v61, 80  ;;  %vm305_vm9 = vcmp.lt.s32.totalorder %v301_v5, 80 }
  0x2b   : > { %259 = vperm.xlu1 %428, %v205_v10  }
  0x2f   : > { %262 = vperm.xlu1 %428, %v206_v11  }
  0x30   : > { %256 = vperm.xlu0 %427, %v204_v12  }
  0x33   : > { %265 = vperm.xlu1 %428, %v207_v13  }
  0xa3   : > { %v217_v14 = vpop.xlane.xlu1 %216  ;;  %v211_v15 = vpop.xlane.xlu0 %210 }
  0xa4   : > { %v223_v16 = vsub.f32 %v202_v1, %v217_v14  ;;  %v221_v17 = vsub.f32 %v200_v2, %v211_v15  ;;  %v300_v1 = vadd.s32 %v297_v55, %v295_v56 }
  0xa6   : > { %v229_v18 = vmul.f32 1.442695, %v223_v16  ;;  %v225_v19 = vmul.f32 1.442695, %v221_v17  ;;  %vm304_vm8 = vcmp.lt.s32.totalorder %v300_v1, 80 }
  0xa7   : > { %v220_v20 = vpop.xlane.xlu1 %219  ;;  %v214_v21 = vpop.xlane.xlu0 %213 }
  0xa8   : > { %429 = vpow2.f32 %v229_v18  ;;  %v224_v22 = vsub.f32 %v203_v3, %v220_v20  ;;  %v222_v23 = vsub.f32 %v201_v6, %v214_v21 }
  0xa9   : > { %431 = vpow2.f32 %v225_v19 }
  0xaa   : > { %v231_v24 = vmul.f32 1.442695, %v224_v22  ;;  %v227_v25 = vmul.f32 1.442695, %v222_v23 }
  0xab   : > { %v260_v26 = vpop.permute.xlu1 %259 }
  0xac   : > { %433 = vpow2.f32 %v231_v24  ;;  %vm268_vm4 = vcmp.eq.s32.totalorder %v254_v31, %v260_v26 }
  0xad   : > { %435 = vpow2.f32 %v227_v25  ;;  %v272_v44 = vsel %vm268_vm4, %v222_v23, 0.0  ;;  %v310_v25 = vld [vmem:[#allocation2] sm:$0x1] }
  0xae   : > { %v278_v45 = vsel %vm208_vm1, %v272_v44, 0.0 }
  0xaf   : > { %v263_v30 = vpop.permute.xlu1 %262  ;;  %v257_v36 = vpop.permute.xlu0 %256 }
  0xb0   : > { %vm269_vm2 = vcmp.eq.s32.totalorder %v254_v31, %v263_v30  ;;  %vm267_vm3 = vcmp.eq.s32.totalorder %v254_v31, %v257_v36 }
  0xb1   : > { %v273_v38 = vsel %vm269_vm2, %v223_v16, 0.0  ;;  %v271_v41 = vsel %vm267_vm3, %v221_v17, 0.0 }
  0xb2   : > { %v430_v28 = vpop.eup %429  ;;  %v281_v40 = vsel %vm208_vm1, %v273_v38, 0.0  ;;  %v275_v43 = vsel %vm208_vm1, %v271_v41, 0.0 }
  0xb3   : > { %v432_v29 = vpop.eup %431  ;;  %v239_v34 = vsel %vm208_vm1, %v430_v28, 0.0  ;;  %v266_v42 = vpop.permute.xlu1 %265 }
  0xb4   : > { %v233_v32 = vsel %vm208_vm1, %v432_v29, 0.0  ;;  %vm270_vm5 = vcmp.eq.s32.totalorder %v254_v31, %v266_v42 }
  0xb5   : > { %234 = vadd.xlane.f32.xlu1 %v233_v32  ;;  %v274_v46 = vsel %vm270_vm5, %v224_v22, 0.0 }
  0xb6   : > { %v434_v33 = vpop.eup %433  ;;  %v284_v47 = vsel %vm208_vm1, %v274_v46, 0.0 }
  0xb7   : > { %v436_v35 = vpop.eup %435  ;;  %v242_v39 = vsel %vm208_vm1, %v434_v33, 0.0 }
  0xb8   : > { %v236_v37 = vsel %vm208_vm1, %v436_v35, 0.0 }
  0xb9   : > { %240 = vadd.xlane.f32.xlu1 %v239_v34  ;;  %237 = vadd.xlane.f32.xlu0 %v236_v37 }
  0xbd   : > { %243 = vadd.xlane.f32.xlu1 %v242_v39  ;;  %282 = vadd.xlane.f32.xlu0 %v281_v40 }
  0xc1   : > { %276 = vadd.xlane.f32.xlu1 %v275_v43 }
  0xc5   : > { %279 = vadd.xlane.f32.xlu1 %v278_v45 }
  0xc9   : > { %285 = vadd.xlane.f32.xlu1 %v284_v47 }
 0x142   : > { %v235_v48 = vpop.xlane.xlu1 %234 }
 0x143   : > { %437 = vlog2.f32 %v235_v48 }
 0x146   : > { %v241_v49 = vpop.xlane.xlu1 %240  ;;  %v238_v50 = vpop.xlane.xlu0 %237 }
 0x147   : > { %439 = vlog2.f32 %v241_v49 }
 0x148   : > { %441 = vlog2.f32 %v238_v50 }
 0x14a   : > { %v244_v52 = vpop.xlane.xlu1 %243  ;;  %v283_v6 = vpop.xlane.xlu0 %282 }
 0x14b   : > { %443 = vlog2.f32 %v244_v52 }
 0x14d   : > { %v438_v54 = vpop.eup %437 }
 0x14e   : > { %v277_v57 = vpop.xlane.xlu1 %276  ;;  %v246_v58 = vmul.f32 0.6931472, %v438_v54 }
 0x150   : > { %v287_v3 = vsub.f32 %v246_v58, %v277_v57 }
 0x151   : > { %v440_v62 = vpop.eup %439 }
 0x152   : > { %v442_v63 = vpop.eup %441  ;;  %v250_v0 = vmul.f32 0.6931472, %v440_v62  ;;  %v280_v2 = vpop.xlane.xlu1 %279  ;;  %v306_v12 = vsel %vm302_vm6, %v287_v3, 0.0 }
 0x153   : > { %v248_v4 = vmul.f32 0.6931472, %v442_v63 }
 0x154   : > { %v289_v8 = vsub.f32 %v250_v0, %v283_v6 }
 0x155   : > { %v444_v7 = vpop.eup %443  ;;  %v288_v9 = vsub.f32 %v248_v4, %v280_v2 }
 0x156   : > { %v252_v10 = vmul.f32 0.6931472, %v444_v7  ;;  %v286_v11 = vpop.xlane.xlu1 %285  ;;  %v308_v16 = vsel %vm304_vm8, %v289_v8, 0.0 }
 0x157   : > { %v307_v13 = vsel %vm303_vm7, %v288_v9, 0.0 }
 0x158   : > { %v311_v14 = vadd.f32 %v307_v13, %v306_v12  ;;  %v290_v15 = vsub.f32 %v252_v10, %v286_v11 }
 0x15a   : > { %v309_v17 = vsel %vm305_vm9, %v290_v15, 0.0  ;;  %v312_v18 = vadd.f32 %v311_v14, %v308_v16 }
 0x15c   : > { %v313_v19 = vadd.f32 %v312_v18, %v309_v17 }
 0x15e   : > { %v314_v20 = vrot.slane %v313_v19, 4 }
 0x160   : > { %v315_v21 = vadd.f32 %v314_v20, %v313_v19 }
 0x162   : > { %v316_v22 = vrot.slane %v315_v21, 2 }
 0x164   : > { %v317_v23 = vadd.f32 %v316_v22, %v315_v21 }
 0x166   : > { %v318_v24 = vrot.slane %v317_v23, 1  ;;  %326 = sbr.rel (%p405_p5) target bundleno = 396 (0x18c), region = 36 }
 0x168   : > { %v319_v26 = vadd.f32 %v318_v24, %v317_v23 }
 0x16a   : > { %v320_v27 = vadd.f32 %v319_v26, %v310_v25 }
 0x16c   : > { %322 = vst.msk [vmem:[#allocation2] sm:$0x1] %vm321_vm10, %v320_v27 }
 0x173   : > { %v327_v28 = vld [vmem:[#allocation2] sm:$0x1] }
 0x174   : > { %v329_v29 = vmul.f32 0.0125, %v327_v28 }
 0x176   : > { %v330_v30 = vsub.f32 0.0, %v329_v29 }
 0x178   : > { %v331_v31 = vmul.f32 1.442695, %v330_v30 }
 0x17a   : > { %445 = vpow2.f32 %v331_v31 }
 0x184   : > { %v446_v32 = vpop.eup %445 }
 0x185   : > { %v333_v33 = vsub.f32 1.0, %v446_v32 }
 0x187   : > { %v334_v34 = vmul.f32 %v333_v33, %v333_v33 }
 0x189   : > { %v335_v35 = vmul.f32 %v334_v34, %v329_v29 }
 0x18b   : > { %336 = vst.msk [vmem:[#allocation3] sm:$0x1] %vm321_vm10, %v335_v35 }
 0x18c PF: > { %p414_p6 = scmp.eq.s32.totalorder %s509_s10, 2  ;;  %s487_s20 = smov [#allocation3]  }
 0x18d   : > { %s344_s21 = sshll.u32 %s487_s20, 4  ;;  %s345_s21 = int_to_ptr.vmem [resolvable:$true] %s344_s21 }
 0x18e   : > { %s447_s22 = scalar_lea.vmem %s345_s21, 16  ;;  %s453_s23 = scalar_lea.vmem %s345_s21, 32 }
 0x18f   : > { %p448_p7 = scmp.ne.s32.totalorder %s345_s21, %s447_s22  ;;  %p454_p10 = scmp.lt.s32.totalorder %s345_s21, %s345_s21 }
 0x190   : > { %p455_p11 = scmp.lt.s32.totalorder %s453_s23, %s447_s22 }
 0x191   : > { %p449_p8 = pnand %p448_p7, %p414_p6 }
 0x192   : > { %p456_p12 = por %p455_p11, %p454_p10 }
 0x193   : > { %p450_p9 = pneg %p449_p8 }
 0x195   : > { %p457_p13 = pnand %p456_p12, %p450_p9 }
 0x197   : > { %460 = shalt.err (!%p457_p13)
}
 0x198   : > { %s461_s26 = scalar_lea.hbm %s563_s2, 16 }
 0x199   : > { %p462_p0 = scmp.ne.s32.totalorder %s563_s2, %s461_s26  ;;  %p467_p3 = scmp.lt.u32.totalorder %s461_s26, %s563_s2 }
 0x19b   : > { %p463_p1 = pnand %p462_p0, %p414_p6 }
 0x19d   : > { %p464_p2 = pneg %p463_p1 }
 0x19f   : > { %p469_p4 = pnand %p467_p3, %p464_p2 }
 0x1a1   : > { %472 = shalt.err (!%p469_p4)
}
 0x1a2   : > { %411 = dma.vmem_to_hbm [thread:$0]  (%p414_p6), %s345_s21, 16, %s563_s2, [#allocation4]  }
 0x1a3   : > { %478 = dma.done.wait (%p414_p6), [#allocation4], 16  }
 0x1a4   : > { %480 = vsyncadd (%p414_p6), [#allocation4], 4294967280 }
 0x1a5 PF: > { %s13_s9 = sadd.s32 1, %s483_s9  }
 0x1a6   : > { %p10_p5 = scmp.ge.s32.totalorder %s13_s9, 5  }
 0x1a8   :  { %12 = sbr.rel (!%p10_p5) target bundleno = 1 (0x1), region = 66 }
 0x1af   :  { %357 = vsyncpa [#allocation4], 1 }
 0x1b0   :  { %359 = vsyncpa [#allocation4 + $0x1], 1 }

</bundles_post_ra>
